<compile_context>
chip_gen: v6e
topology: v6e:2x2x1
jax: 0.10.0
libtpu: 0.0.40
codegen_flags: <defaults>
</compile_context>

<pallas_src>
import math

import jax
import jax.numpy as jnp
from jax.experimental import pallas as pl
from jax.experimental.pallas import tpu as pltpu


def _build_pe_table(d_model: int, max_len: int = 1024, dtype=jnp.float32) -> jnp.ndarray:
    """sin/cos positional-encoding table, identical to the PyTorch __init__.
    Shape [max_len, d_model]."""
    assert d_model % 2 == 0, "PositionalEncoding requires an even d_model"
    pos = jnp.arange(0, max_len, dtype=jnp.float32)[:, None]              # [max_len, 1]
    div = jnp.exp(
        jnp.arange(0, d_model, 2, dtype=jnp.float32)
        * (-math.log(10000.0) / d_model)
    )                                                                     # [d_model/2]
    pe = jnp.zeros((max_len, d_model), dtype=jnp.float32)
    pe = pe.at[:, 0::2].set(jnp.sin(pos * div))
    pe = pe.at[:, 1::2].set(jnp.cos(pos * div))
    return pe.astype(dtype)                                               # [max_len, d_model]


def _pos_enc_kernel(x_ref, pe_ref, o_ref):
    # x_ref/o_ref: (tr, tc) lane-dense tile; pe_ref: (1, tc) broadcast over rows.
    # Cast pe on the VPU (free — kernel is HBM-bound) in case pe dtype != x dtype.
    o_ref[...] = x_ref[...] + pe_ref[...].astype(x_ref.dtype)


def _tile_budget_bytes() -> int:
    """Per-buffer tile budget: bigger on v7x (3.2 TB/s HBM) so the ~0.35 us
    per-grid-step overhead stays hidden; conservative on v5e."""
    try:
        kind = jax.devices()[0].device_kind.lower()
    except Exception:  # pragma: no cover - CPU / interpret fallback
        kind = ""
    if "v7" in kind:
        return 4 << 20
    if "v6" in kind:
        return 2 << 20
    return 1 << 20


def _pick_row_tile(B: int, itemsize: int) -> int:
    """Row tile = native sublane pack (8 f32, 16 bf16, 32 int8/fp8) so vregs are
    fully packed; ragged final row block is masked by Pallas (cdiv grid)."""
    pack = max(8, 32 // max(1, itemsize))
    if B >= pack:
        return pack
    if B >= 8 and B % 8 == 0:
        return 8
    return B  # full extent — always a legal block shape


def _pick_col_tile(L: int, tr: int, itemsize: int, budget: int) -> int:
    """Budget-max multiple of 128 (ragged final block allowed); full extent only
    when L < 128 (tiny shapes where masked stores are unavoidable)."""
    aligned_cap = (L // 128) * 128
    if aligned_cap == 0:
        return L
    max_elems = max(128, budget // max(1, tr * itemsize))
    return max(128, min((max_elems // 128) * 128, aligned_cap))


def positional_encoding_forward(x: jnp.ndarray, pe_table: jnp.ndarray,
                                *, donate_x: bool = False) -> jnp.ndarray:
    """x: [B, S, D]; pe_table: [max_len, D].  Returns x + pe_table[None, :S, :]."""
    B, S, D = x.shape
    max_len, Dp = pe_table.shape
    assert D == Dp and S <= max_len
    L = S * D

    # Lane-dense 2-D views (row-major → layout no-ops): flattened column
    # s*D + d of x matches column s*D + d of the flattened pe table.
    x2 = x.reshape(B, L)
    pe_flat = pe_table.reshape(1, max_len * D)

    itemsize = jnp.dtype(x.dtype).itemsize
    pe_itemsize = jnp.dtype(pe_table.dtype).itemsize
    budget = _tile_budget_bytes()
    tr = _pick_row_tile(B, itemsize)
    tc = _pick_col_tile(L, tr, itemsize, budget)

    if tc % 128 == 0:
        # Lane-aligned tile: the BlockSpec performs the [:S*D] column selection
        # against the whole flattened table (no wrapper-side slice/copy).
        pe_arg = pe_flat
    else:
        # Tiny (L < 128) fallback: full-extent column block needs an exact-width pe.
        pe_arg = pe_flat[:, :L]

    nrow = pl.cdiv(B, tr)
    ncol = pl.cdiv(L, tc)

    if ncol >= 2:
        # Column axis OUTER, row axis INNER: pe block index is constant across
        # consecutive grid steps → DMA'd once per column block, not per row block.
        grid = (ncol, nrow)
        x_map = lambda j, i: (i, j)
        pe_map = lambda j, i: (0, j)
    else:
        # pe fits one tile → its reuse is moot; put rows outer so v7x megacore
        # still has >=2 blocks on the sharded axis when B is large.
        grid = (nrow, ncol)
        x_map = lambda i, j: (i, j)
        pe_map = lambda i, j: (0, j)

    # Double-buffered x + out tiles, double-buffered pe slice, plus slack.
    needed = 4 * tr * tc * itemsize + 2 * tc * pe_itemsize + (4 << 20)
    vmem_limit = int(min(max(needed, 32 << 20), 48 << 20))  # < v7x's 64 MiB physical

    cost = pl.CostEstimate(
        flops=B * L,
        transcendentals=0,
        bytes_accessed=2 * B * L * itemsize + min(L, max_len * D) * pe_itemsize,
    )

    out2 = pl.pallas_call(
        _pos_enc_kernel,
        out_shape=jax.ShapeDtypeStruct((B, L), x.dtype),
        grid_spec=pltpu.PrefetchScalarGridSpec(
            num_scalar_prefetch=0,
            grid=grid,
            in_specs=[
                pl.BlockSpec((tr, tc), x_map),    # x tile
                pl.BlockSpec((1, tc), pe_map),    # pe follows the column tile
            ],
            out_specs=pl.BlockSpec((tr, tc), x_map),
        ),
        compiler_params=pltpu.CompilerParams(
            # Every grid point writes a disjoint output block → both axes are
            # parallel; lets v7x shard the outer axis across its two TensorCores.
            dimension_semantics=("parallel", "parallel"),
            vmem_limit_bytes=vmem_limit,
        ),
        input_output_aliases=({0: 0} if donate_x else {}),
        cost_estimate=cost,
    )(x2, pe_arg)

    return out2.reshape(B, S, D)


if __name__ == "__main__":
    # Small shapes consistent with the module: batch=2, seq=8, d_model=32.
    B, S, D = 2, 8, 32
    max_len = 1024

    key = jax.random.PRNGKey(0)
    x = jax.random.normal(key, (B, S, D), dtype=jnp.float32)

    # Keep pe in f32 like the PyTorch module (bit-parity for f32 activations);
    # callers with bf16 activations may pass a bf16 table to halve pe traffic.
    pe_table = _build_pe_table(D, max_len=max_len, dtype=jnp.float32)

    out = positional_encoding_forward(x, pe_table)
    out = jax.block_until_ready(out)

    # Reference check in plain JAX (same semantics as the PyTorch forward).
    ref = x + pe_table[None, :S, :].astype(x.dtype)
    assert out.shape == (B, S, D)
    assert jnp.allclose(out, ref, atol=1e-6), "mismatch vs reference"

    print("KERNEL_OK")
</pallas_src>

<mosaic_0001>
module attributes {stable_mosaic.version = 11 : i64} {
  func.func @_pos_enc_kernel(%arg0: i32, %arg1: i32, %arg2: memref<2x256xf32, #tpu.memory_space<vmem>>, %arg3: memref<1x256xf32, #tpu.memory_space<vmem>>, %arg4: memref<2x256xf32, #tpu.memory_space<vmem>>) attributes {dimension_semantics = [#tpu.dimension_semantics<parallel>, #tpu.dimension_semantics<parallel>], iteration_bounds = array<i64: 1, 1>, scalar_prefetch = 0 : i64, scratch_operands = 0 : i64, tpu.core_type = #tpu.core_type<tc>, window_params = [{transform_indices = @transform_0, window_bounds = array<i64: 2, 256>}, {transform_indices = @transform_1, window_bounds = array<i64: 1, 256>}, {transform_indices = @transform_2, window_bounds = array<i64: 2, 256>}]} {
    %c0 = arith.constant 0 : index
    %c0_0 = arith.constant 0 : index
    %0 = vector.load %arg2[%c0, %c0_0] : memref<2x256xf32, #tpu.memory_space<vmem>>, vector<2x256xf32>
    %c0_1 = arith.constant 0 : index
    %c0_2 = arith.constant 0 : index
    %1 = vector.load %arg3[%c0_1, %c0_2] : memref<1x256xf32, #tpu.memory_space<vmem>>, vector<1x256xf32>
    %2 = vector.broadcast %1 : vector<1x256xf32> to vector<2x256xf32>
    %3 = arith.addf %0, %2 : vector<2x256xf32>
    %c0_3 = arith.constant 0 : index
    %c0_4 = arith.constant 0 : index
    %4 = vector.load %arg4[%c0_3, %c0_4] : memref<2x256xf32, #tpu.memory_space<vmem>>, vector<2x256xf32>
    tpu.vector_store %arg4[%c0_3, %c0_4], %3 {strides = array<i32>} : memref<2x256xf32, #tpu.memory_space<vmem>>, vector<2x256xf32>,
    return
  }
  func.func @transform_0(%arg0: i32, %arg1: i32) -> (i32, i32) {
    %c0_i32 = arith.constant 0 : i32
    return %arg0, %arg1 : i32, i32
  }
  func.func @transform_1(%arg0: i32, %arg1: i32) -> (i32, i32) {
    %c0_i32 = arith.constant 0 : i32
    %c0_i32_0 = arith.constant 0 : i32
    return %c0_i32, %arg1 : i32, i32
  }
  func.func @transform_2(%arg0: i32, %arg1: i32) -> (i32, i32) {
    %c0_i32 = arith.constant 0 : i32
    return %arg0, %arg1 : i32, i32
  }
}

</mosaic_0001>

<bundles_post_ra>
// kernel: tpu_custom_call.1
= control target key start
LH: loop header
LB: loop body
LE: loop exit
PB: predicated region body
PF: predicated region fallthrough
CT: control target
= control target key end

     0   :  { %7 = vsyncpa [#allocation3], 0  ;;  %s172_s0 = inlined_call_operand.hbm [shape: f32[2,256], index: 0, kind: input, shape index: {}]   ;;  %s173_s1 = inlined_call_operand.hbm [shape: f32[1,32768], index: 1, kind: input, shape index: {}]   ;;  %s174_s2 = inlined_call_operand.hbm [shape: f32[2,256], index: 2, kind: output, shape index: {}]  }
   0x1   :  { %8 = vsyncpa [#allocation6], 0 }
   0x2   :  { %9 = vsyncpa [#allocation4], 0  ;;  %s144_s9 = smov [#allocation2]   ;;  %s145_s11 = smov [#allocation5]  }
   0x3   :  { %s16_s10 = sshll.u32 %s144_s9, 4  ;;  %s26_s12 = sshll.u32 %s145_s11, 4  ;;  %s17_s10 = int_to_ptr.vmem [resolvable:$true] %s16_s10  ;;  %s27_s12 = int_to_ptr.vmem [resolvable:$true] %s26_s12 }
   0x4   :  { %s86_s13 = scalar_lea.vmem %s17_s10, 64  ;;  %p91_p1 = scmp.lt.s32.totalorder %s17_s10, %s17_s10 }
   0x5   :  { %p87_p0 = scmp.ne.s32.totalorder %s17_s10, %s86_s13  ;;  %p92_p2 = scmp.lt.s32.totalorder %s86_s13, %s86_s13 }
   0x7   :  { %p93_p3 = por %p92_p2, %p91_p1 }
   0x9   :  { %p94_p4 = pnand %p93_p3, %p87_p0 }
   0xb   :  { %97 = shalt.err (!%p94_p4)
}
   0xc   :  { %19 = dma.hbm_to_vmem [thread:$0]  %s172_s0, 64, %s17_s10, [#allocation3]  }
   0xd   :  { %s106_s16 = scalar_lea.vmem %s27_s12, 32  ;;  %p111_p6 = scmp.lt.s32.totalorder %s27_s12, %s27_s12 }
   0xe   :  { %p107_p5 = scmp.ne.s32.totalorder %s27_s12, %s106_s16  ;;  %p112_p7 = scmp.lt.s32.totalorder %s106_s16, %s106_s16 }
  0x10   :  { %p113_p8 = por %p112_p7, %p111_p6 }
  0x12   :  { %p114_p9 = pnand %p113_p8, %p107_p5 }
  0x14   :  { %117 = shalt.err (!%p114_p9)
}
  0x15   :  { %29 = dma.hbm_to_vmem [thread:$0]  %s173_s1, 32, %s27_s12, [#allocation6]  }
  0x16   :  { %138 = dma.done.wait [#allocation3], 64  }
  0x17   :  { %139 = vsyncadd [#allocation3], 4294967232 }
  0x18   :  { %140 = dma.done.wait [#allocation6], 32  }
  0x19   :  { %141 = vsyncadd [#allocation6], 4294967264  ;;  %v39_v0 = vlaneseq  ;;  %v146_v1 = vmov 1983009808   ;;  %v37_v7 = vld [vmem:[#allocation5] sm:$0x3] }
  0x1a   :  { %v49_v2 = vunpack.c.l.s4 %v146_v1  ;;  %v36_v12 = vld [vmem:[#allocation2] sm:$0xf]  ;;  %s147_s0 = smov [#allocation7]  }
  0x1b   :  { %v40_v3 = vshrl.u32 %v39_v0, 7  ;;  %s64_s19 = sshll.u32 %s147_s0, 4  ;;  %s65_s19 = int_to_ptr.vmem [resolvable:$true] %s64_s19 }
  0x1c   :  { %v50_v6 = vunpack.c.0.s8 %v49_v2  ;;  %s118_s1 = scalar_lea.vmem %s65_s19, 64  ;;  %p123_p11 = scmp.lt.s32.totalorder %s65_s19, %s65_s19 }
  0x1d   :  { %v41_v4 = vsub.s32 0, %v40_v3  ;;  %v45_v5 = vsub.s32 1, %v40_v3  ;;  %p119_p10 = scmp.ne.s32.totalorder %s65_s19, %s118_s1  ;;  %p124_p12 = scmp.lt.s32.totalorder %s118_s1, %s118_s1 }
  0x1e   :  { %v53_v10 = vsub.s32 %v50_v6, %v40_v3 }
  0x1f   :  { %v42_v8 = vrot.slane %v37_v7, %v41_v4  ;;  %v46_v9 = vrot.slane %v37_v7, %v45_v5  ;;  %p125_p13 = por %p124_p12, %p123_p11 }
  0x21   :  { %v47_v11 = vcombine.low %v42_v8, %v46_v9  ;;  %p126_p0 = pnand %p125_p13, %p119_p10 }
  0x23   :  { %v54_v13 = vrot.slane %v47_v11, %v53_v10 }
  0x25   :  { %v56_v14 = vadd.f32 %v54_v13, %v36_v12 }
  0x27   :  { %57 = vst [vmem:[#allocation7] sm:$0xf] %v56_v14 }
  0x28   :  { %129 = shalt.err (!%p126_p0)
}
  0x29   :  { %67 = dma.vmem_to_hbm [thread:$0]  %s65_s19, 64, %s174_s2, [#allocation4]  }
  0x2a   :  { %142 = dma.done.wait [#allocation4], 64  }
  0x2b   :  { %143 = vsyncadd [#allocation4], 4294967232 }
  0x2c   :  { %71 = vsyncpa [#allocation3], 1 }
  0x2d   :  { %72 = vsyncpa [#allocation6], 1 }
  0x2e   :  { %73 = vsyncpa [#allocation4], 1 }

</bundles_post_ra>
